<compile_context>
chip_gen: v7x
topology: tpu7x:2x2x1
jax: 0.10.0
libtpu: 0.0.40
codegen_flags: <defaults>
</compile_context>

<pallas_src>
import jax
import jax.numpy as jnp
from jax.experimental import pallas as pl
from jax.experimental.pallas import tpu as pltpu

_LANES = 128
_SUBLANES = 8
_TARGET_BLOCK_BYTES = 2 * 1024 * 1024  # ~2 MiB per block (in+out double-buffered -> ~8 MiB)


def _cdiv(a, b):
    return (a + b - 1) // b


def _round_up(a, b):
    return _cdiv(a, b) * b


def _affine_sigmoid_kernel(w_ref, b_ref, x_ref, o_ref):
    # Load in native dtype, compute affine + sigmoid in f32 (VPU + EUP), cast on store.
    x = x_ref[...].astype(jnp.float32)
    y = jax.nn.sigmoid(x * w_ref[0] + b_ref[0])
    o_ref[...] = y.astype(o_ref.dtype)


def conv_transpose1x1_sigmoid(x, weight, bias, padding):
    """x: (N, 1, H, W). weight: (1, 1, 1, 1). bias: (1,).

    Equivalent to torch.sigmoid(ConvTranspose2d(1,1,k=1,s=1,padding=padding)(x)).
    """
    n, c, h, w = x.shape
    assert c == 1, "module has in_channels = out_channels = 1"
    h_out = h - 2 * padding
    w_out = w - 2 * padding
    if h_out <= 0 or w_out <= 0:
        # Matches PyTorch: padding=(10000,10000) on a 6x6 input is an error.
        raise ValueError("padding too large for input (negative output size)")

    # --- crop in the wrapper; allow_input_fusion lets XLA fuse this into the kernel ---
    xc = x[:, :, padding:padding + h_out, padding:padding + w_out]

    total = n * c * h_out * w_out
    itemsize = jnp.dtype(x.dtype).itemsize
    # Sublane granularity for this dtype (f32 -> 8, bf16 -> 16, int8/fp8 -> 32).
    sub = _SUBLANES * max(1, 4 // itemsize)

    # Free (contiguous) 2-D view: lane-dense if possible, else natural (rows, W_out).
    if total % _LANES == 0:
        view_rows, view_cols = total // _LANES, _LANES
    else:
        view_rows, view_cols = n * h_out, w_out
    x2d = xc.reshape(view_rows, view_cols)

    # Tile rows: ~2 MiB blocks, multiple of `sub`, and >= 2 grid steps when possible
    # (so v7x megacore can shard the "parallel" axis). Edge blocks are clipped by Pallas.
    if view_rows > sub:
        by_bytes = max((_TARGET_BLOCK_BYTES // (view_cols * itemsize)) // sub * sub, sub)
        half = _round_up(_cdiv(view_rows, 2), sub)
        tile_rows = min(by_bytes, half)
    else:
        tile_rows = view_rows  # equals the full dim -> always a legal block shape
    num_tiles = _cdiv(view_rows, tile_rows)

    w_s = weight.reshape(1).astype(jnp.float32)
    b_s = bias.reshape(1).astype(jnp.float32)

    cost = pl.CostEstimate(
        flops=2 * total,
        transcendentals=total,
        bytes_accessed=2 * total * itemsize,
    )

    out2d = pl.pallas_call(
        _affine_sigmoid_kernel,
        out_shape=jax.ShapeDtypeStruct((view_rows, view_cols), x.dtype),
        grid=(num_tiles,),
        in_specs=[
            pl.BlockSpec(memory_space=pltpu.SMEM),                    # weight scalar
            pl.BlockSpec(memory_space=pltpu.SMEM),                    # bias scalar
            pl.BlockSpec((tile_rows, view_cols), lambda i: (i, 0)),   # input tile
        ],
        out_specs=pl.BlockSpec((tile_rows, view_cols), lambda i: (i, 0)),
        compiler_params=pltpu.CompilerParams(
            dimension_semantics=("parallel",),
            vmem_limit_bytes=32 * 1024 * 1024,
            allow_input_fusion=[False, False, True],
        ),
        cost_estimate=cost,
    )(w_s, b_s, x2d)

    return out2d.reshape(n, c, h_out, w_out)


if __name__ == "__main__":
    key = jax.random.PRNGKey(0)
    kx, kw, kb, kx2 = jax.random.split(key, 4)

    # ConvTranspose2d(1, 1, 1) parameters: weight (in=1, out=1, 1, 1), bias (1,)
    weight = jax.random.normal(kw, (1, 1, 1, 1), dtype=jnp.float32) * 0.5
    bias = jax.random.normal(kb, (1,), dtype=jnp.float32) * 0.1

    # Case 1: single-channel image with a crop (exercises the non-lane-dense view).
    H, W, PAD = 16, 16, 2
    x = jax.random.normal(kx, (1, 1, H, W), dtype=jnp.float32)
    out = conv_transpose1x1_sigmoid(x, weight, bias, PAD)
    out = jax.block_until_ready(out)
    ref = jax.nn.sigmoid(
        x[:, :, PAD:H - PAD, PAD:W - PAD] * weight.reshape(()) + bias.reshape(())
    )
    assert out.shape == (1, 1, H - 2 * PAD, W - 2 * PAD)
    assert jnp.allclose(out, ref, atol=1e-6), "mismatch vs reference (case 1)"

    # Case 2: element count divisible by 128 (exercises the lane-dense view), no crop.
    x2 = jax.random.normal(kx2, (2, 1, 16, 16), dtype=jnp.float32)
    out2 = conv_transpose1x1_sigmoid(x2, weight, bias, 0)
    out2 = jax.block_until_ready(out2)
    ref2 = jax.nn.sigmoid(x2 * weight.reshape(()) + bias.reshape(()))
    assert out2.shape == x2.shape
    assert jnp.allclose(out2, ref2, atol=1e-6), "mismatch vs reference (case 2)"

    print("KERNEL_OK")
</pallas_src>

<mosaic_0001>
module attributes {stable_mosaic.version = 11 : i64} {
  func.func @_affine_sigmoid_kernel(%arg0: i32, %arg1: memref<1xf32, #tpu.memory_space<smem>>, %arg2: memref<1xf32, #tpu.memory_space<smem>>, %arg3: memref<8x12xf32, #tpu.memory_space<vmem>>, %arg4: memref<8x12xf32, #tpu.memory_space<vmem>>) attributes {dimension_semantics = [#tpu.dimension_semantics<parallel>], iteration_bounds = array<i64: 2>, scalar_prefetch = 0 : i64, scratch_operands = 0 : i64, tpu.core_type = #tpu.core_type<tc>, window_params = [{transform_indices = @transform_0, window_bounds = array<i64: 1>}, {transform_indices = @transform_1, window_bounds = array<i64: 1>}, {transform_indices = @transform_2, window_bounds = array<i64: 8, 12>}, {transform_indices = @transform_3, window_bounds = array<i64: 8, 12>}]} {
    %c0 = arith.constant 0 : index
    %c0_0 = arith.constant 0 : index
    %0 = vector.load %arg3[%c0, %c0_0] : memref<8x12xf32, #tpu.memory_space<vmem>>, vector<8x12xf32>
    %c0_1 = arith.constant 0 : index
    %1 = memref.load %arg1[%c0_1] : memref<1xf32, #tpu.memory_space<smem>>
    %2 = vector.broadcast %1 : f32 to vector<8x12xf32>
    %3 = arith.mulf %0, %2 : vector<8x12xf32>
    %c0_2 = arith.constant 0 : index
    %4 = memref.load %arg2[%c0_2] : memref<1xf32, #tpu.memory_space<smem>>
    %5 = vector.broadcast %4 : f32 to vector<8x12xf32>
    %6 = arith.addf %3, %5 : vector<8x12xf32>
    %7 = arith.negf %6 : vector<8x12xf32>
    %8 = math.exp %7 : vector<8x12xf32>
    %cst = arith.constant 1.000000e+00 : f32
    %9 = vector.broadcast %cst : f32 to vector<8x12xf32>
    %10 = arith.addf %9, %8 : vector<8x12xf32>
    %11 = arith.divf %9, %10 : vector<8x12xf32>
    %c0_3 = arith.constant 0 : index
    %c0_4 = arith.constant 0 : index
    %12 = vector.load %arg4[%c0_3, %c0_4] : memref<8x12xf32, #tpu.memory_space<vmem>>, vector<8x12xf32>
    tpu.vector_store %arg4[%c0_3, %c0_4], %11 {strides = array<i32>} : memref<8x12xf32, #tpu.memory_space<vmem>>, vector<8x12xf32>,
    return
  }
  func.func @transform_0(%arg0: i32) -> i32 {
    %c0_i32 = arith.constant 0 : i32
    %c0_i32_0 = arith.constant 0 : i32
    return %c0_i32 : i32
  }
  func.func @transform_1(%arg0: i32) -> i32 {
    %c0_i32 = arith.constant 0 : i32
    %c0_i32_0 = arith.constant 0 : i32
    return %c0_i32 : i32
  }
  func.func @transform_2(%arg0: i32) -> (i32, i32) {
    %c0_i32 = arith.constant 0 : i32
    %c0_i32_0 = arith.constant 0 : i32
    return %arg0, %c0_i32 : i32, i32
  }
  func.func @transform_3(%arg0: i32) -> (i32, i32) {
    %c0_i32 = arith.constant 0 : i32
    %c0_i32_0 = arith.constant 0 : i32
    return %arg0, %c0_i32 : i32, i32
  }
}

</mosaic_0001>

<bundles_post_ra>
// kernel: tpu_custom_call.1
= control target key start
LH: loop header
LB: loop body
LE: loop exit
PB: predicated region body
PF: predicated region fallthrough
CT: control target
= control target key end

     0   :  { %s637_s0 = inlined_call_operand.<no memory space> [shape: f32[1], index: 0, kind: input, shape index: {}]   ;;  %s638_s1 = inlined_call_operand.<no memory space> [shape: f32[1], index: 1, kind: input, shape index: {}]   ;;  %s639_s2 = inlined_call_operand.hbm [shape: f32[12,12], index: 2, kind: input, shape index: {}]   ;;  %s640_s3 = inlined_call_operand.hbm [shape: f32[12,12], index: 3, kind: output, shape index: {}]  }
   0x1   :  { %8 = sst [smem:[#allocation2]] %s637_s0 }
   0x2   :  { %9 = sst [smem:[#allocation3]] %s638_s1 }
   0x3   :  { %10 = vsyncpa [#allocation5], 0 }
   0x4   :  { %12 = vsyncpa [#allocation5 + $0x1], 0 }
   0x5   :  { %13 = vsyncpa [#allocation6], 0 }
   0x6   :  { %15 = vsyncpa [#allocation6 + $0x1], 0  ;;  %s476_s16 = smov 0   ;;  %s478_s17 = smov 0  }
   0x7   :  { %s480_s18 = smov 0   ;;  %s482_s19 = smov 0  }
   0x8 LB: > { %s497_s0 = sadd.s32 4294967295, %s446_s19   ;;  %s287_s1 = sadd.s32 4294967294, %s446_s19   ;;  %s446_s19 = sphi %s482_s19, %s655_s19   ;;  %s442_s18 = sphi %s480_s18, %s654_s18   ;;  %s438_s17 = sphi %s478_s17, %s653_s17   ;;  %s434_s16 = sphi %s476_s16, %s652_s16  }
   0x9   : > { %s501_s20 = sadd.s32 1, %s446_s19   ;;  %s70_s21 = sadd.s32 1, %s442_s18 }
   0xa   : > { %s67_s22 = ssub.s32 %s446_s19, %s501_s20  ;;  %p77_p0 = scmp.ne.s32.totalorder %s442_s18, %s438_s17 }
   0xb   : > { %p68_p1 = scmp.eq.s32.totalorder %s67_s22, 0  ;;  %p78_p2 = scmp.eq.s32.totalorder %s446_s19, 0 }
   0xc   : > { %p83_p3 = scmp.ne.s32.totalorder %s438_s17, %s434_s16  ;;  %p84_p4 = scmp.eq.s32.totalorder %s497_s0, 0 }
   0xd   : > { %s513_s23 = scalar_select %p68_p1, %s442_s18, %s70_s21  }
   0xe   : > { %p515_p5 = por %p78_p2, %p77_p0  ;;  %p519_p6 = por %p84_p4, %p83_p3 }
   0xf   : > { %p107_p7 = scmp.eq.s32.totalorder %s497_s0, 1  ;;  %p113_p8 = scmp.eq.s32.totalorder %s287_s1, 1 }
  0x10   : > { %p312_p10 = scmp.lt.s32.totalorder %s446_s19, 2  ;;  %s139_s28 = sand.u32 1, %s442_s18  }
  0x11   : > { %p526_p11 = por %p107_p7, %p77_p0  ;;  %p530_p12 = por %p113_p8, %p83_p3 }
  0x12   : > { %s291_s29 = sshll.u32 %s446_s19, 7  ;;  %s290_s30 = sshll.u32 %s139_s28, 3 }
  0x13   : > { %s644_s26 = scalar_select %p526_p11, 1, 0 }
  0x14   : > { %s645_s27 = scalar_select %p530_p12, 1, 0 }
  0x15   : > { %s539_s6 = scalar_lea.hbm %s639_s2, %s291_s29  ;;  %s143_s7 = scalar_lea.vmem [#allocation4], %s290_s30 }
  0x16   : > { %s150_s8 = sshll.u32 %s143_s7, 4  ;;  %p543_p13 = pnand %p312_p10, %p515_p5  ;;  %s547_s8 = int_to_ptr.vmem [resolvable:$true] %s150_s8 }
  0x17   : > { %s140_s10 = scalar_lea.sflag [#allocation5], %s139_s28  ;;  %s350_s11 = scalar_lea.hbm %s539_s6, 128 }
  0x18   : > { %p351_p2 = scmp.ne.s32.totalorder %s539_s6, %s350_s11  ;;  %p352_p3 = pneg %p543_p13 }
  0x19   : > { %s355_s14 = scalar_lea.hbm %s639_s2, 256  ;;  %p356_p5 = scmp.lt.u32.totalorder %s539_s6, %s639_s2 }
  0x1a   : > { %p353_p4 = pnand %p352_p3, %p351_p2  ;;  %p357_p8 = scmp.lt.u32.totalorder %s355_s14, %s350_s11 }
  0x1b   : > { %p359_p9 = scmp.lt.u32.totalorder %s350_s11, %s539_s6 }
  0x1c   : > { %p354_p7 = pneg %p353_p4  ;;  %p358_p10 = por %p357_p8, %p356_p5 }
  0x1e   : > { %p360_p0 = por %p359_p9, %p358_p10 }
  0x20   : > { %p361_p1 = pnand %p360_p0, %p354_p7 }
  0x22   : > { %364 = shalt.err (!%p361_p1)
}
  0x23   : > { %s365_s21 = scalar_lea.vmem %s547_s8, 128  ;;  %s448_s22 = smov [#allocation4]  }
  0x24   : > { %p366_p2 = scmp.ne.s32.totalorder %s547_s8, %s365_s21  ;;  %s370_s24 = sshll.u32 %s448_s22, 4  ;;  %s371_s24 = int_to_ptr.vmem [resolvable:$false] %s370_s24 }
  0x25   : > { %s372_s28 = scalar_lea.vmem %s371_s24, 256  ;;  %p373_p11 = scmp.lt.s32.totalorder %s547_s8, %s371_s24 }
  0x26   : > { %p368_p4 = pnand %p366_p2, %p352_p3  ;;  %p374_p5 = scmp.lt.s32.totalorder %s372_s28, %s365_s21 }
  0x28   : > { %p369_p12 = pneg %p368_p4  ;;  %p375_p8 = por %p374_p5, %p373_p11 }
  0x2a   : > { %p376_p9 = pnand %p375_p8, %p369_p12 }
  0x2c   : > { %379 = shalt.err (!%p376_p9)
}
  0x2d   : > { %307 = dma.hbm_to_vmem [thread:$0]  (!%p543_p13), %s539_s6, 128, %s547_s8, %s140_s10  }
  0x2e   : > { %p647_p0 = scmp.lt.s32.totalorder %s446_s19, 3  ;;  %p648_p1 = scmp.ge.s32.totalorder %s446_s19, 1 }
  0x30   : > { %p156_p3 = pnand %p648_p1, %p647_p0 }
  0x31   : > { %s581_s29 = sand.u32 (!%p156_p3), 1, %s438_s17  }
  0x32   : > { %159 = sbr.rel (%p156_p3) target bundleno = 109 (0x6d), region = 32  ;;  %s293_s30 = sshll.u32 (!%p156_p3), %s581_s29, 3 }
  0x33   : > { %s162_s4 = scalar_lea.sflag (!%p156_p3), [#allocation5], %s581_s29  ;;  %s165_s5 = scalar_lea.vmem (!%p156_p3), [#allocation4], %s293_s30 }
  0x39   : > { %425 = dma.done.wait (%p519_p6), %s162_s4, 128  }
  0x3a   : > { %427 = vsyncadd (%p519_p6), %s162_s4, 4294967168  ;;  %s189_s6 = sld [smem:[#allocation2]]  ;;  %v188_v0 = vld [vmem:[%s165_s5] sm:$0xff]  ;;  %s187_s8 = scalar_lea.vmem [#allocation7], %s293_s30  ;;  %vm201_vm0 = vcmask 97280  }
  0x3b   : > { %s192_s7 = sld [smem:[#allocation3]]  ;;  %s217_s9 = sshll.u32 %s187_s8, 4  ;;  %s590_s9 = int_to_ptr.vmem [resolvable:$true] %s217_s9 }
  0x3c   : > { %s297_s10 = sshll.u32 %s497_s0, 7  ;;  %s204_s13 = scalar_lea.sflag [#allocation6], %s581_s29 }
  0x3d   : > { %s595_s12 = scalar_lea.hbm %s640_s3, %s297_s10  ;;  %s380_s14 = scalar_lea.vmem %s590_s9, 128 }
  0x3e   : > { %p381_p6 = scmp.ne.s32.totalorder %s590_s9, %s380_s14  ;;  %p649_p11 = scmp.ne.s32.totalorder %s644_s26, 0 }
  0x3f   : > { %s449_s0 = smov [#allocation7]  }
  0x40   : > { %v190_v1 = vstv %s189_s6  ;;  %p382_p12 = pnand %p381_p6, %p649_p11  ;;  %s384_s15 = sshll.u32 %s449_s0, 4  ;;  %s385_s15 = int_to_ptr.vmem [resolvable:$false] %s384_s15 }
  0x41   : > { %v193_v2 = vstv %s192_s7  ;;  %v191_v3 = vmul.f32 %v190_v1, %v188_v0  ;;  %s386_s1 = scalar_lea.vmem %s385_s15, 256  ;;  %p387_p7 = scmp.lt.s32.totalorder %s590_s9, %s385_s15 }
  0x42   : > { %p383_p13 = pneg %p382_p12  ;;  %p388_p10 = scmp.lt.s32.totalorder %s386_s1, %s380_s14 }
  0x43   : > { %v194_v4 = vadd.f32 %v193_v2, %v191_v3 }
  0x44   : > { %p389_p2 = por %p388_p10, %p387_p7 }
  0x45   : > { %v295_v5 = vmul.f32 -1.442695, %v194_v4 }
  0x46   : > { %p390_p4 = pnand %p389_p2, %p383_p13 }
  0x47   : > { %346 = vpow2.f32 %v295_v5 }
  0x51   : > { %v347_v6 = vpop.eup %346 }
  0x52   : > { %v198_v7 = vadd.f32 1.0, %v347_v6 }
  0x54   : > { %348 = vrcp.f32 %v198_v7 }
  0x5e   : > { %v349_v8 = vpop.eup %348 }
  0x5f   : > { %202 = vst.msk [vmem:[%s187_s8] sm:$0xff] %vm201_vm0, %v349_v8 }
  0x60   : > { %393 = shalt.err (!%p390_p4)
}
  0x61   : > { %s394_s21 = scalar_lea.hbm %s595_s12, 128  ;;  %s398_s28 = scalar_lea.hbm %s640_s3, 256 }
  0x62   : > { %p395_p5 = scmp.ne.s32.totalorder %s595_s12, %s394_s21  ;;  %p399_p0 = scmp.lt.u32.totalorder %s595_s12, %s640_s3 }
  0x63   : > { %p400_p1 = scmp.lt.u32.totalorder %s398_s28, %s394_s21  ;;  %p402_p6 = scmp.lt.u32.totalorder %s394_s21, %s595_s12 }
  0x64   : > { %p396_p8 = pnand %p395_p5, %p649_p11 }
  0x65   : > { %p401_p3 = por %p400_p1, %p399_p0 }
  0x66   : > { %p397_p9 = pneg %p396_p8 }
  0x67   : > { %p403_p12 = por %p402_p6, %p401_p3 }
  0x69   : > { %p404_p13 = pnand %p403_p12, %p397_p9 }
  0x6b   : > { %407 = shalt.err (!%p404_p13)
}
  0x6c   : > { %302 = dma.vmem_to_hbm [thread:$0]  (%p649_p11), %s590_s9, 128, %s595_s12, %s204_s13  }
  0x6d PF: > { %s229_s4 = sand.u32 1, %s434_s16   ;;  %p650_p7 = scmp.ne.s32.totalorder %s645_s27, 0 }
  0x6e   : > { %p651_p10 = scmp.ge.s32.totalorder %s446_s19, 2  ;;  %s230_s5 = scalar_lea.sflag [#allocation6], %s229_s4 }
  0x70   : > { %p309_p2 = pnand %p651_p10, %p650_p7 }
  0x72   : > { %429 = dma.done.wait (!%p309_p2), %s230_s5, 128  }
  0x73   : > { %431 = vsyncadd (!%p309_p2), %s230_s5, 4294967168  ;;  %p18_p4 = scmp.ge.s32.totalorder %s501_s20, 4   ;;  %s652_s16 = smov %s438_s17 }
  0x74   : > { %s653_s17 = smov %s442_s18  ;;  %s654_s18 = smov %s513_s23 }
  0x75   : > { %s655_s19 = smov %s501_s20  ;;  %20 = sbr.rel (!%p18_p4) target bundleno = 8 (0x8), region = 77 }
  0x7c   :  { %235 = vsyncpa [#allocation5], 1 }
  0x7d   :  { %237 = vsyncpa [#allocation5 + $0x1], 1 }
  0x7e   :  { %238 = vsyncpa [#allocation6], 1 }
  0x7f   :  { %240 = vsyncpa [#allocation6 + $0x1], 1 }

</bundles_post_ra>
